<compile_context>
chip_gen: v7x
topology: tpu7x:2x2x1
jax: 0.10.0
libtpu: 0.0.40
codegen_flags: <defaults>
</compile_context>

<pallas_src>
import functools

import jax
import jax.numpy as jnp
from jax.experimental import pallas as pl
from jax.experimental.pallas import tpu as pltpu


def _round_up(x: int, m: int) -> int:
    return ((x + m - 1) // m) * m


def _info_nce_kernel(a_ref, b_ref, bd_ref, o_ref, m_ref, l_ref, *,
                     inv_temp: float, n_cols: int, block_n: int, mask_cols: bool):
    j = pl.program_id(1)

    @pl.when(j == 0)
    def _():
        m_ref[...] = jnp.full_like(m_ref, -jnp.inf)
        l_ref[...] = jnp.zeros_like(l_ref)

    a = a_ref[...]                       # (TM, D) anchor rows (resident across j)
    b = b_ref[...]                       # (TN, D) current features1 column tile

    # Fused F.normalize(dim=1) + 1/temperature: one per-row scale on `a` only.
    # rsqrt lands on the EUP slot; removes the O(N^2) post-matmul divide.
    sumsq = jnp.sum(a * a, axis=1, keepdims=True)
    scale = jax.lax.rsqrt(jnp.maximum(sumsq, 1e-24)) * inv_temp   # eps^2 = (1e-12)^2
    a_s = a * scale                      # (TM, D)

    # Similarity tile on the MXU; contract dim 1 of both operands so no
    # explicit b.T / XLU transpose copy is materialized.
    s = jax.lax.dot_general(
        a_s, b, (((1,), (1,)), ((), ())),
        preferred_element_type=jnp.float32)                       # (TM, TN)

    if mask_cols:
        # Only needed when N was padded: keep padded columns out of the lse.
        col = jax.lax.broadcasted_iota(jnp.int32, s.shape, 1) + j * block_n
        s = jnp.where(col < n_cols, s, -jnp.inf)

    # Online (flash-style) logsumexp update.
    m_prev = m_ref[...]
    m_new = jnp.maximum(m_prev, jnp.max(s, axis=1, keepdims=True))
    corr = jnp.exp(m_prev - m_new)
    l_ref[...] = corr * l_ref[...] + jnp.sum(jnp.exp(s - m_new), axis=1,
                                             keepdims=True)
    m_ref[...] = m_new

    @pl.when(j == pl.num_programs(1) - 1)
    def _():
        lse = m_ref[...] + jnp.log(l_ref[...])                    # (TM, 1)
        # Positive logit: diag(sim)/T as a row-wise dot product against the
        # row-aligned features1 tile (block index constant over j -> one DMA).
        diag = jnp.sum(a_s * bd_ref[...], axis=1, keepdims=True)  # (TM, 1)
        # Lane-dense store of the per-row loss (broadcast over 128 lanes).
        o_ref[...] = jnp.broadcast_to(lse - diag, o_ref.shape)


def info_nce_sep_loss(features, features1, y=None, temperature: float = 0.1,
                      block_m: int = 256, block_n: int = 512):
    """JAX/Pallas equivalent of InfoNCESep.forward (y is unused, as in PyTorch)."""
    del y
    # View-0 selection stays in the wrapper: `b` is re-read once per row tile
    # inside the kernel, so streaming only the (N, D) view-0 slab is cheaper
    # than DMAing all n_views per tile.
    a = features[:, 0, :].astype(jnp.float32)    # (N, D)
    b = features1[:, 0, :].astype(jnp.float32)   # (N, D)
    n, d = a.shape

    # --- tile selection (sublane-aligned; shrink to the problem when small) ---
    n8 = _round_up(n, 8)
    tm = min(block_m, n8)
    n_pad = _round_up(n, tm)
    tn = min(block_n, n_pad)
    if n_pad % tn != 0:
        tn = tm                                   # tm always divides n_pad

    if n_pad != n:
        pad = n_pad - n
        a = jnp.pad(a, ((0, pad), (0, 0)))
        b = jnp.pad(b, ((0, pad), (0, 0)))

    grid = (n_pad // tm, n_pad // tn)
    mask_cols = n_pad != n

    # Scoped-VMEM budget: double-buffered input tiles + s tile + output + scratch,
    # with headroom; clamped well under v7x's 64 MiB physical VMEM.
    # TODO(synk): add a K (hidden-dim) grid axis if D ever gets large enough that
    # the (tile, D) operand tiles alone exceed the VMEM budget.
    est = 4 * (2 * tm * d + 2 * tn * d + 2 * tm * d + tm * tn + 2 * tm * 128 + 4 * tm)
    vmem_limit = int(min(max(est * 5 // 4 + (4 << 20), 16 << 20), 60 << 20))

    kernel = functools.partial(
        _info_nce_kernel,
        inv_temp=1.0 / float(temperature),
        n_cols=n, block_n=tn, mask_cols=mask_cols)

    per_row = pl.pallas_call(
        kernel,
        out_shape=jax.ShapeDtypeStruct((n_pad, 128), jnp.float32),
        grid=grid,
        in_specs=[
            pl.BlockSpec((tm, d), lambda i, j: (i, 0)),   # anchor rows
            pl.BlockSpec((tn, d), lambda i, j: (j, 0)),   # features1 column tile
            pl.BlockSpec((tm, d), lambda i, j: (i, 0)),   # features1 rows (diagonal)
        ],
        out_specs=pl.BlockSpec((tm, 128), lambda i, j: (i, 0)),
        scratch_shapes=[
            pltpu.VMEM((tm, 1), jnp.float32),   # running max
            pltpu.VMEM((tm, 1), jnp.float32),   # running sum-of-exp
        ],
        compiler_params=pltpu.CompilerParams(
            dimension_semantics=("parallel", "arbitrary"),
            vmem_limit_bytes=vmem_limit,
        ),
    )(a, b, b)

    # Per-row loss sits (broadcast) in lane 0 of each row; drop padded rows and
    # finish the mean on the host side.
    return jnp.sum(per_row[:n, 0]) / n


def _reference_loss(features, features1, temperature: float = 0.1):
    # Pure-JAX reference mirroring the PyTorch math, for a sanity check.
    a = features[:, 0, :].astype(jnp.float32)
    b = features1[:, 0, :].astype(jnp.float32)
    a = a / jnp.maximum(jnp.linalg.norm(a, axis=1, keepdims=True), 1e-12)
    s = (a @ b.T) / temperature
    lse = jax.nn.logsumexp(s, axis=1)
    diag = jnp.diagonal(s)
    return jnp.mean(lse - diag)


if __name__ == "__main__":
    key = jax.random.PRNGKey(0)
    k1, k2, k3, k4, k5 = jax.random.split(key, 5)

    # Small shapes consistent with the module: (batch, n_views, hidden).
    batch, n_views, hidden = 8, 5, 32
    features = jax.random.normal(k1, (batch, n_views, hidden), dtype=jnp.float32)
    features1 = jax.random.normal(k2, (batch, n_views, hidden), dtype=jnp.float32)
    y = jax.random.normal(k3, (batch,), dtype=jnp.float32)  # unused, like in PyTorch

    loss = info_nce_sep_loss(features, features1, y, temperature=0.1)
    loss = jax.block_until_ready(loss)
    ref = _reference_loss(features, features1, temperature=0.1)
    assert jnp.allclose(loss, ref, rtol=1e-5, atol=1e-4), (loss, ref)

    # Ragged batch with forced-small tiles: exercises the multi-tile online
    # logsumexp, row/column padding and masking paths.
    f2 = jax.random.normal(k4, (30, n_views, hidden), dtype=jnp.float32)
    f2b = jax.random.normal(k5, (30, n_views, hidden), dtype=jnp.float32)
    loss2 = info_nce_sep_loss(f2, f2b, None, temperature=0.1, block_m=8, block_n=16)
    loss2 = jax.block_until_ready(loss2)
    ref2 = _reference_loss(f2, f2b, temperature=0.1)
    assert jnp.allclose(loss2, ref2, rtol=1e-5, atol=1e-4), (loss2, ref2)

    print("KERNEL_OK")
</pallas_src>

<mosaic_0001>
module attributes {stable_mosaic.version = 11 : i64} {
  func.func @_info_nce_kernel(%arg0: i32, %arg1: i32, %arg2: memref<8x32xf32, #tpu.memory_space<vmem>>, %arg3: memref<8x32xf32, #tpu.memory_space<vmem>>, %arg4: memref<8x32xf32, #tpu.memory_space<vmem>>, %arg5: memref<8x128xf32, #tpu.memory_space<vmem>>, %arg6: memref<8x1xf32, #tpu.memory_space<vmem>>, %arg7: memref<8x1xf32, #tpu.memory_space<vmem>>) attributes {dimension_semantics = [#tpu.dimension_semantics<parallel>, #tpu.dimension_semantics<arbitrary>], iteration_bounds = array<i64: 1, 1>, scalar_prefetch = 0 : i64, scratch_operands = 2 : i64, tpu.core_type = #tpu.core_type<tc>, window_params = [{transform_indices = @transform_0, window_bounds = array<i64: 8, 32>}, {transform_indices = @transform_1, window_bounds = array<i64: 8, 32>}, {transform_indices = @transform_2, window_bounds = array<i64: 8, 32>}, {transform_indices = @transform_3, window_bounds = array<i64: 8, 128>}]} {
    %c0_i32 = arith.constant 0 : i32
    %0 = arith.cmpi eq, %arg1, %c0_i32 : i32
    %1 = arith.extui %0 : i1 to i32
    %c0_i32_0 = arith.constant 0 : i32
    %2 = arith.cmpi ne, %1, %c0_i32_0 : i32
    scf.if %2 {
      %cst_19 = arith.constant 0xFF800000 : f32
      %35 = vector.broadcast %cst_19 : f32 to vector<8x1xf32>
      %c0_20 = arith.constant 0 : index
      %c0_21 = arith.constant 0 : index
      %36 = vector.load %arg6[%c0_20, %c0_21] : memref<8x1xf32, #tpu.memory_space<vmem>>, vector<8x1xf32>
      tpu.vector_store %arg6[%c0_20, %c0_21], %35 {strides = array<i32>} : memref<8x1xf32, #tpu.memory_space<vmem>>, vector<8x1xf32>,
      %cst_22 = arith.constant 0.000000e+00 : f32
      %37 = vector.broadcast %cst_22 : f32 to vector<8x1xf32>
      %c0_23 = arith.constant 0 : index
      %c0_24 = arith.constant 0 : index
      %38 = vector.load %arg7[%c0_23, %c0_24] : memref<8x1xf32, #tpu.memory_space<vmem>>, vector<8x1xf32>
      tpu.vector_store %arg7[%c0_23, %c0_24], %37 {strides = array<i32>} : memref<8x1xf32, #tpu.memory_space<vmem>>, vector<8x1xf32>,
    } else {
    }
    %c0 = arith.constant 0 : index
    %c0_1 = arith.constant 0 : index
    %3 = vector.load %arg2[%c0, %c0_1] : memref<8x32xf32, #tpu.memory_space<vmem>>, vector<8x32xf32>
    %c0_2 = arith.constant 0 : index
    %c0_3 = arith.constant 0 : index
    %4 = vector.load %arg3[%c0_2, %c0_3] : memref<8x32xf32, #tpu.memory_space<vmem>>, vector<8x32xf32>
    %5 = arith.mulf %3, %3 : vector<8x32xf32>
    %cst = arith.constant dense<0.000000e+00> : vector<8xf32>
    %6 = vector.multi_reduction <add>, %5, %cst [1] : vector<8x32xf32> to vector<8xf32>
    %7 = vector.shape_cast %6 : vector<8xf32> to vector<8x1xf32>
    %cst_4 = arith.constant 1.000000e-24 : f32
    %8 = vector.broadcast %cst_4 : f32 to vector<8x1xf32>
    %9 = arith.maximumf %7, %8 : vector<8x1xf32>
    %10 = math.rsqrt %9 : vector<8x1xf32>
    %cst_5 = arith.constant 1.000000e+01 : f32
    %11 = vector.broadcast %cst_5 : f32 to vector<8x1xf32>
    %12 = arith.mulf %10, %11 : vector<8x1xf32>
    %13 = vector.broadcast %12 : vector<8x1xf32> to vector<8x32xf32>
    %14 = arith.mulf %3, %13 : vector<8x32xf32>
    %cst_6 = arith.constant dense<0.000000e+00> : vector<8x8xf32>
    %15 = tpu.matmul %14, %4, %cst_6 {dimension_numbers = #tpu.dot_dimension_numbers<[1], [1], [0], [0], [0, 0, 1, 0], [], []>} : vector<8x32xf32>, vector<8x32xf32>, vector<8x8xf32> -> vector<8x8xf32>
    %c0_7 = arith.constant 0 : index
    %c0_8 = arith.constant 0 : index
    %16 = vector.load %arg6[%c0_7, %c0_8] : memref<8x1xf32, #tpu.memory_space<vmem>>, vector<8x1xf32>
    %cst_9 = arith.constant dense<0xFF800000> : vector<8xf32>
    %17 = vector.multi_reduction <maximumf>, %15, %cst_9 [1] : vector<8x8xf32> to vector<8xf32>
    %18 = vector.shape_cast %17 : vector<8xf32> to vector<8x1xf32>
    %19 = arith.maximumf %16, %18 : vector<8x1xf32>
    %20 = arith.subf %16, %19 : vector<8x1xf32>
    %21 = math.exp %20 : vector<8x1xf32>
    %c0_10 = arith.constant 0 : index
    %c0_11 = arith.constant 0 : index
    %22 = vector.load %arg7[%c0_10, %c0_11] : memref<8x1xf32, #tpu.memory_space<vmem>>, vector<8x1xf32>
    %23 = arith.mulf %21, %22 : vector<8x1xf32>
    %24 = vector.broadcast %19 : vector<8x1xf32> to vector<8x8xf32>
    %25 = arith.subf %15, %24 : vector<8x8xf32>
    %26 = math.exp %25 : vector<8x8xf32>
    %cst_12 = arith.constant dense<0.000000e+00> : vector<8xf32>
    %27 = vector.multi_reduction <add>, %26, %cst_12 [1] : vector<8x8xf32> to vector<8xf32>
    %28 = vector.shape_cast %27 : vector<8xf32> to vector<8x1xf32>
    %29 = arith.addf %23, %28 : vector<8x1xf32>
    %c0_13 = arith.constant 0 : index
    %c0_14 = arith.constant 0 : index
    %30 = vector.load %arg7[%c0_13, %c0_14] : memref<8x1xf32, #tpu.memory_space<vmem>>, vector<8x1xf32>
    tpu.vector_store %arg7[%c0_13, %c0_14], %29 {strides = array<i32>} : memref<8x1xf32, #tpu.memory_space<vmem>>, vector<8x1xf32>,
    %c0_15 = arith.constant 0 : index
    %c0_16 = arith.constant 0 : index
    %31 = vector.load %arg6[%c0_15, %c0_16] : memref<8x1xf32, #tpu.memory_space<vmem>>, vector<8x1xf32>
    tpu.vector_store %arg6[%c0_15, %c0_16], %19 {strides = array<i32>} : memref<8x1xf32, #tpu.memory_space<vmem>>, vector<8x1xf32>,
    %c0_i32_17 = arith.constant 0 : i32
    %32 = arith.cmpi eq, %arg1, %c0_i32_17 : i32
    %33 = arith.extui %32 : i1 to i32
    %c0_i32_18 = arith.constant 0 : i32
    %34 = arith.cmpi ne, %33, %c0_i32_18 : i32
    scf.if %34 {
      %c0_19 = arith.constant 0 : index
      %c0_20 = arith.constant 0 : index
      %35 = vector.load %arg6[%c0_19, %c0_20] : memref<8x1xf32, #tpu.memory_space<vmem>>, vector<8x1xf32>
      %c0_21 = arith.constant 0 : index
      %c0_22 = arith.constant 0 : index
      %36 = vector.load %arg7[%c0_21, %c0_22] : memref<8x1xf32, #tpu.memory_space<vmem>>, vector<8x1xf32>
      %37 = math.log %36 : vector<8x1xf32>
      %38 = arith.addf %35, %37 : vector<8x1xf32>
      %c0_23 = arith.constant 0 : index
      %c0_24 = arith.constant 0 : index
      %39 = vector.load %arg4[%c0_23, %c0_24] : memref<8x32xf32, #tpu.memory_space<vmem>>, vector<8x32xf32>
      %40 = arith.mulf %14, %39 : vector<8x32xf32>
      %cst_25 = arith.constant dense<0.000000e+00> : vector<8xf32>
      %41 = vector.multi_reduction <add>, %40, %cst_25 [1] : vector<8x32xf32> to vector<8xf32>
      %42 = vector.shape_cast %41 : vector<8xf32> to vector<8x1xf32>
      %43 = arith.subf %38, %42 : vector<8x1xf32>
      %44 = vector.shape_cast %43 : vector<8x1xf32> to vector<8x1xf32>
      %45 = vector.broadcast %44 : vector<8x1xf32> to vector<8x128xf32>
      %c0_26 = arith.constant 0 : index
      %c0_27 = arith.constant 0 : index
      %46 = vector.load %arg5[%c0_26, %c0_27] : memref<8x128xf32, #tpu.memory_space<vmem>>, vector<8x128xf32>
      tpu.vector_store %arg5[%c0_26, %c0_27], %45 {strides = array<i32>} : memref<8x128xf32, #tpu.memory_space<vmem>>, vector<8x128xf32>,
    } else {
    }
    return
  }
  func.func @transform_0(%arg0: i32, %arg1: i32) -> (i32, i32) {
    %c0_i32 = arith.constant 0 : i32
    %c0_i32_0 = arith.constant 0 : i32
    return %arg0, %c0_i32 : i32, i32
  }
  func.func @transform_1(%arg0: i32, %arg1: i32) -> (i32, i32) {
    %c0_i32 = arith.constant 0 : i32
    %c0_i32_0 = arith.constant 0 : i32
    return %arg1, %c0_i32 : i32, i32
  }
  func.func @transform_2(%arg0: i32, %arg1: i32) -> (i32, i32) {
    %c0_i32 = arith.constant 0 : i32
    %c0_i32_0 = arith.constant 0 : i32
    return %arg0, %c0_i32 : i32, i32
  }
  func.func @transform_3(%arg0: i32, %arg1: i32) -> (i32, i32) {
    %c0_i32 = arith.constant 0 : i32
    %c0_i32_0 = arith.constant 0 : i32
    return %arg0, %c0_i32 : i32, i32
  }
}

</mosaic_0001>

<bundles_post_ra>
// kernel: tpu_custom_call.1
= control target key start
LH: loop header
LB: loop body
LE: loop exit
PB: predicated region body
PF: predicated region fallthrough
CT: control target
= control target key end

     0   :  { %8 = vsyncpa [#allocation5], 0  ;;  %s413_s0 = inlined_call_operand.hbm [shape: f32[8,32], index: 0, kind: input, shape index: {}]   ;;  %s414_s1 = inlined_call_operand.hbm [shape: f32[8,32], index: 1, kind: input, shape index: {}]   ;;  %s415_s2 = inlined_call_operand.hbm [shape: f32[8,32], index: 2, kind: input, shape index: {}]   ;;  %s416_s3 = inlined_call_operand.hbm [shape: f32[8,128], index: 3, kind: output, shape index: {}]  }
   0x1   :  { %9 = vsyncpa [#allocation8], 0 }
   0x2   :  { %10 = vsyncpa [#allocation6], 0  ;;  %s327_s12 = smov [#allocation7]   ;;  %s328_s14 = smov [#allocation4]  }
   0x3   :  { %s27_s13 = sshll.u32 %s327_s12, 4  ;;  %s17_s15 = sshll.u32 %s328_s14, 4  ;;  %s28_s13 = int_to_ptr.vmem [resolvable:$true] %s27_s13  ;;  %s18_s15 = int_to_ptr.vmem [resolvable:$true] %s17_s15 }
   0x4   :  { %s233_s18 = scalar_lea.hbm %s414_s1, 128 }
   0x5   :  { %p234_p0 = scmp.ne.s32.totalorder %s414_s1, %s233_s18  ;;  %p237_p1 = scmp.lt.u32.totalorder %s233_s18, %s414_s1 }
   0x7   :  { %p239_p2 = pnand %p237_p1, %p234_p0 }
   0x9   :  { %242 = shalt.err (!%p239_p2)
}
   0xa   :  { %s243_s23 = scalar_lea.vmem %s28_s13, 128  ;;  %p248_p4 = scmp.lt.s32.totalorder %s28_s13, %s28_s13 }
   0xb   :  { %p244_p3 = scmp.ne.s32.totalorder %s28_s13, %s243_s23  ;;  %p249_p5 = scmp.lt.s32.totalorder %s243_s23, %s243_s23 }
   0xd   :  { %p250_p6 = por %p249_p5, %p248_p4 }
   0xf   :  { %p251_p7 = pnand %p250_p6, %p244_p3 }
  0x11   :  { %254 = shalt.err (!%p251_p7)
}
  0x12   :  { %30 = dma.hbm_to_vmem [thread:$0]  %s414_s1, 128, %s28_s13, [#allocation8]  }
  0x13   :  { %s255_s28 = scalar_lea.hbm %s413_s0, 128 }
  0x14   :  { %p256_p8 = scmp.ne.s32.totalorder %s413_s0, %s255_s28  ;;  %p259_p9 = scmp.lt.u32.totalorder %s255_s28, %s413_s0 }
  0x16   :  { %p261_p10 = pnand %p259_p9, %p256_p8 }
  0x18   :  { %264 = shalt.err (!%p261_p10)
}
  0x19   :  { %s265_s6 = scalar_lea.vmem %s18_s15, 128  ;;  %p270_p12 = scmp.lt.s32.totalorder %s18_s15, %s18_s15 }
  0x1a   :  { %p266_p11 = scmp.ne.s32.totalorder %s18_s15, %s265_s6  ;;  %p271_p13 = scmp.lt.s32.totalorder %s265_s6, %s265_s6 }
  0x1c   :  { %p272_p0 = por %p271_p13, %p270_p12 }
  0x1e   :  { %p273_p1 = pnand %p272_p0, %p266_p11 }
  0x20   :  { %276 = shalt.err (!%p273_p1)
}
  0x21   :  { %20 = dma.hbm_to_vmem [thread:$0]  %s413_s0, 128, %s18_s15, [#allocation5]  }
  0x22   :  { %s329_s8 = smov [#allocation9]   ;;  %s277_s12 = scalar_lea.hbm %s415_s2, 128 }
  0x23   :  { %s37_s9 = sshll.u32 %s329_s8, 4  ;;  %p278_p2 = scmp.ne.s32.totalorder %s415_s2, %s277_s12  ;;  %s38_s9 = int_to_ptr.vmem [resolvable:$true] %s37_s9 }
  0x24   :  { %p281_p3 = scmp.lt.u32.totalorder %s277_s12, %s415_s2 }
  0x26   :  { %p283_p4 = pnand %p281_p3, %p278_p2 }
  0x28   :  { %286 = shalt.err (!%p283_p4)
}
  0x29   :  { %s287_s18 = scalar_lea.vmem %s38_s9, 128  ;;  %p292_p6 = scmp.lt.s32.totalorder %s38_s9, %s38_s9 }
  0x2a   :  { %p288_p5 = scmp.ne.s32.totalorder %s38_s9, %s287_s18  ;;  %p293_p7 = scmp.lt.s32.totalorder %s287_s18, %s287_s18 }
  0x2c   :  { %p294_p8 = por %p293_p7, %p292_p6 }
  0x2e   :  { %p295_p9 = pnand %p294_p8, %p288_p5 }
  0x30   :  { %298 = shalt.err (!%p295_p9)
}
  0x31   :  { %40 = dma.hbm_to_vmem [thread:$0]  %s415_s2, 128, %s38_s9, [#allocation8]  }
  0x32   :  { %321 = dma.done.wait [#allocation5], 128  }
  0x33   :  { %322 = vsyncadd [#allocation5], 4294967168 }
  0x34   :  { %323 = dma.done.wait [#allocation8], 256  }
  0x35   :  { %324 = vsyncadd [#allocation8], 4294967040  ;;  %v57_v0 = vld [vmem:[#allocation4] sm:$0xff]  ;;  %vm60_vm0 = vcmask 261120   ;;  %v330_v3 = vmov 0.0   ;;  %v58_v4 = vld [vmem:[#allocation7] sm:$0xff] }
  0x36   :  { %v59_v1 = vmul.f32 %v57_v0, %v57_v0  ;;  %210 = vmatprep.subr.mxu0 %v330_v3  ;;  %vm54_vm1 = vcmask 7168   ;;  %v331_v5 = vmov -inf   ;;  %vm332_vm2 = vmmov 0   ;;  %v178_v11 = vld [vmem:[#allocation9] sm:$0xff]  ;;  %s334_s2 = smov [#allocation10]  }
  0x37   :  { %211 = vmatpush3.xpose.msk.msra.mxu0 %vm60_vm0, %v58_v4  ;;  %55 = vst.msk [vmem:[#allocation2] sm:$0xff] %vm54_vm1, %v331_v5  ;;  %56 = vst.msk [vmem:[#allocation3] sm:$0xff] %vm54_vm1, %v330_v3  ;;  %212 = vmatprep.mubr.msk.f32.mxu0 %vm332_vm2, %v330_v3  ;;  %vm145_vm3 = vcmask 64512   ;;  %v333_v17 = vmov 0   ;;  %s196_s19 = sshll.u32 %s334_s2, 4  ;;  %s197_s19 = int_to_ptr.vmem [resolvable:$true] %s196_s19 }
  0x38   :  { %v61_v2 = vsel %vm60_vm0, %v59_v1, 0.0  ;;  %223 = vset.pattern.permute.xlu1 %v333_v17  ;;  %224 = vset.pattern.permute.xlu0 %v333_v17  ;;  %s299_s20 = scalar_lea.vmem %s197_s19, 128  ;;  %p304_p11 = scmp.lt.s32.totalorder %s197_s19, %s197_s19 }
  0x39   :  { %62 = vadd.xlane.f32.xlu0 %v61_v2  ;;  %p300_p10 = scmp.ne.s32.totalorder %s197_s19, %s299_s20  ;;  %p305_p12 = scmp.lt.s32.totalorder %s299_s20, %s299_s20 }
  0x3b   :  { %p306_p13 = por %p305_p12, %p304_p11 }
  0x3d   :  { %p307_p0 = pnand %p306_p13, %p300_p10 }
  0x3e   :  { %v144_v18 = vld [vmem:[#allocation2] sm:$0xff]  ;;  %v153_v29 = vld [vmem:[#allocation3] sm:$0xff] }
  0xc6   :  { %v63_v6 = vpop.xlane.xlu0 %62 }
  0xc7   :  { %v64_v7 = vmax.f32 %v63_v6, 1e-24 }
  0xc9   :  { %225 = vrsqrt.f32 %v64_v7 }
  0xd3   :  { %v226_v8 = vpop.eup %225 }
  0xd4   :  { %v66_v9 = vmul.f32 10.0, %v226_v8 }
  0xd6   :  { %v67_v10 = vmul.f32 %v66_v9, %v57_v0 }
  0xd8   :  { %213 = vmatmul.mubr.msk.f32.vlgmr.msra.gmra.mrb[0].mxu0 %vm60_vm0, %v67_v10  ;;  %v179_v15 = vmul.f32 %v178_v11, %v67_v10 }
  0xda   :  { %v180_v16 = vsel %vm60_vm0, %v179_v15, 0.0 }
 0x1ab   :  { %v140_v12 = vpop.f32.mrb[0].mxu0 }
 0x1ac   :  { %v214_v13 = vpop.f32.mrb[1].mxu0  ;;  %v146_v14 = vsel %vm145_vm3, %v140_v12, -inf }
 0x1ad   :  { %147 = vmax.xlane.f32.xlu0 %v146_v14 }
 0x1b1   :  { %181 = vadd.xlane.f32.xlu0 %v180_v16 }
 0x23a   :  { %v148_v19 = vpop.xlane.xlu0 %147 }
 0x23b   :  { %v149_v20 = vmax.f32 %v144_v18, %v148_v19 }
 0x23d   :  { %v150_v21 = vsub.f32 %v144_v18, %v149_v20  ;;  %169 = vst.msk [vmem:[#allocation2] sm:$0xff] %vm54_vm1, %v149_v20  ;;  %157 = vperm.xlu1 %223, %v149_v20  }
 0x23e   :  { %v182_v38 = vpop.xlane.xlu0 %181 }
 0x23f   :  { %v151_v27 = vmul.f32 1.442695, %v150_v21 }
 0x244   :  { %v173_v36 = vld [vmem:[#allocation2] sm:$0xff] }
 0x2bc   :  { %v158_v22 = vpop.permute.xlu1 %157 }
 0x2bd   :  { %v160_v23 = vsub.f32 %v140_v12, %v158_v22 }
 0x2bf   :  { %v161_v24 = vmul.f32 1.442695, %v160_v23 }
 0x2c1   :  { %227 = vpow2.f32 %v161_v24 }
 0x2c2   :  { %229 = vpow2.f32 %v151_v27 }
 0x2cb   :  { %v228_v25 = vpop.eup %227 }
 0x2cc   :  { %v163_v26 = vsel %vm145_vm3, %v228_v25, 0.0  ;;  %v230_v28 = vpop.eup %229 }
 0x2cd   :  { %164 = vadd.xlane.f32.xlu1 %v163_v26  ;;  %v154_v30 = vmul.f32 %v230_v28, %v153_v29 }
 0x35a   :  { %v165_v31 = vpop.xlane.xlu1 %164 }
 0x35b   :  { %v166_v32 = vadd.f32 %v165_v31, %v154_v30 }
 0x35d   :  { %168 = vst.msk [vmem:[#allocation3] sm:$0xff] %vm54_vm1, %v166_v32 }
 0x364   :  { %v174_v33 = vld [vmem:[#allocation3] sm:$0xff] }
 0x365   :  { %231 = vlog2.f32 %v174_v33 }
 0x36f   :  { %v232_v34 = vpop.eup %231 }
 0x370   :  { %v176_v35 = vmul.f32 0.6931472, %v232_v34 }
 0x372   :  { %v177_v37 = vadd.f32 %v176_v35, %v173_v36 }
 0x374   :  { %v183_v39 = vsub.f32 %v177_v37, %v182_v38 }
 0x376   :  { %186 = vperm.xlu0 %224, %v183_v39  }
 0x3f5   :  { %v187_v40 = vpop.permute.xlu0 %186 }
 0x3f6   :  { %189 = vst [vmem:[#allocation10] sm:$0xff] %v187_v40 }
 0x3f7   :  { %310 = shalt.err (!%p307_p0)
}
 0x3f8   :  { %s311_s23 = scalar_lea.hbm %s416_s3, 128 }
 0x3f9   :  { %p312_p1 = scmp.ne.s32.totalorder %s416_s3, %s311_s23  ;;  %p315_p2 = scmp.lt.u32.totalorder %s311_s23, %s416_s3 }
 0x3fb   :  { %p317_p3 = pnand %p315_p2, %p312_p1 }
 0x3fd   :  { %320 = shalt.err (!%p317_p3)
}
 0x3fe   :  { %199 = dma.vmem_to_hbm [thread:$0]  %s197_s19, 128, %s416_s3, [#allocation6]  }
 0x3ff   :  { %325 = dma.done.wait [#allocation6], 128  }
 0x400   :  { %326 = vsyncadd [#allocation6], 4294967168 }
 0x401   :  { %203 = vsyncpa [#allocation5], 1 }
 0x402   :  { %204 = vsyncpa [#allocation8], 1 }
 0x403   :  { %205 = vsyncpa [#allocation6], 1 }

</bundles_post_ra>
